<compile_context>
chip_gen: v7x
topology: tpu7x:2x2x1
jax: 0.10.0
libtpu: 0.0.40
codegen_flags: <defaults>
</compile_context>

<pallas_src>
import functools

import jax
import jax.numpy as jnp
from jax.experimental import pallas as pl
from jax.experimental.pallas import tpu as pltpu


def _channel_attention_kernel(x_ref, w1t_ref, w2t_ref, o_ref, sum_sc, max_sc,
                              *, hw_total, needs_mask):
    hw = pl.program_id(1)
    n_hw = pl.num_programs(1)
    is_last = hw == n_hw - 1

    # --- init accumulators on the first HW tile -------------------------------
    @pl.when(hw == 0)
    def _():
        sum_sc[...] = jnp.zeros_like(sum_sc)
        max_sc[...] = jnp.full_like(max_sc, -jnp.inf)

    def _accumulate(x_sum, x_max):
        # f32 accumulation; exact max.
        sum_sc[...] += jnp.sum(x_sum, axis=-1, dtype=jnp.float32)        # (B, C)
        max_sc[...] = jnp.maximum(max_sc[...],
                                  jnp.max(x_max, axis=-1).astype(jnp.float32))

    # --- accumulate this HW tile ----------------------------------------------
    if needs_mask:
        # Only the final HW tile can contain out-of-range (padded) columns, so
        # the mask cost (iota + compare + 2 selects) is paid there only; every
        # other tile is pure vld + VALU.
        @pl.when(jnp.logical_not(is_last))
        def _():
            x = x_ref[...]                                               # (B, C, T_HW)
            _accumulate(x, x)

        @pl.when(is_last)
        def _():
            x = x_ref[...]
            t_hw = x.shape[-1]
            pos = hw * t_hw + jax.lax.broadcasted_iota(jnp.int32, x.shape, 2)
            valid = pos < hw_total
            _accumulate(jnp.where(valid, x, jnp.zeros_like(x)),
                        jnp.where(valid, x, jnp.full_like(x, -jnp.inf)))
    else:
        x = x_ref[...]
        _accumulate(x, x)

    # --- finalize on the last HW tile: fused shared MLP + sigmoid -------------
    @pl.when(is_last)
    def _():
        avg = sum_sc[...] * jnp.float32(1.0 / hw_total)                  # (B, C)
        mx = max_sc[...]                                                 # (B, C)
        b = avg.shape[0]

        pooled = jnp.concatenate([avg, mx], axis=0)                      # (2B, C)
        w1t = w1t_ref[...].astype(jnp.float32)                           # (C, Cr)
        w2t = w2t_ref[...].astype(jnp.float32)                           # (Cr, C)

        h = jnp.dot(pooled, w1t, preferred_element_type=jnp.float32)     # (2B, Cr)
        h = jnp.maximum(h, 0.0)
        y = jnp.dot(h, w2t, preferred_element_type=jnp.float32)          # (2B, C)

        out = jax.nn.sigmoid(y[:b] + y[b:])                              # (B, C)
        o_ref[...] = out.astype(o_ref.dtype)


def _tpu_config():
    """Generation-aware VMEM / block-size / TensorCore-count defaults."""
    kind = ""
    try:
        kind = jax.devices()[0].device_kind.lower()
    except Exception:
        pass
    vmem_cap = None
    try:
        info = pltpu.get_tpu_info()
        vmem_cap = getattr(info, "vmem_capacity_bytes", None)
    except Exception:
        pass

    is_v7 = "v7" in kind
    if vmem_cap is None:
        vmem_cap = (64 << 20) if is_v7 else (128 << 20)

    if is_v7 or vmem_cap <= (64 << 20):
        # v7x-class: 64 MiB physical VMEM, 2 TensorCores per chip.
        return {"vmem_limit_bytes": 44 << 20,
                "max_block_bytes": 10 << 20,
                "num_tensorcores": 2 if is_v7 else 1}
    # v5e / v6e-class: 128 MiB physical VMEM, single TensorCore.
    return {"vmem_limit_bytes": 64 << 20,
            "max_block_bytes": 24 << 20,
            "num_tensorcores": 1}


def _choose_tiling(N, C, HW, x_itemsize, weight_bytes, cfg):
    """Pick (B, T_HW) so 2*x_block + weights + scratch fits the VMEM budget."""
    max_block = cfg["max_block_bytes"]
    vmem_limit = cfg["vmem_limit_bytes"]
    num_tc = cfg["num_tensorcores"]

    # --- batch block ------------------------------------------------------
    if num_tc >= 2 and N > 1:
        # Keep >= 2 grid steps on the "parallel" batch axis so both v7x
        # TensorCores get work.
        B = min(8, -(-N // 2))
    else:
        # Single-TensorCore chip (v5e/v6e): splitting the batch axis is pure
        # per-step overhead, so take the whole (small) batch per step.
        B = min(N, 8)

    # --- HW tile floor (DMA contiguity) ------------------------------------
    t_floor = 512 if x_itemsize >= 4 else 1024
    t_floor = min(HW, max(128, t_floor))
    if t_floor < HW:
        t_floor = max(128, (t_floor // 128) * 128)   # lane-aligned when tiling

    headroom = int(vmem_limit * 0.85)

    def per_buffer_cap(b):
        scratch = 2 * b * C * 4                       # f32 sum + max scratch
        avail = headroom - 2 * weight_bytes - scratch  # weights double-buffered
        return max(0, min(max_block, avail // 2))      # x block is double-buffered

    # Shrink B until even the minimum HW tile fits the per-buffer budget.
    while B > 1 and B * C * t_floor * x_itemsize > per_buffer_cap(B):
        B = max(1, B // 2)

    cap = per_buffer_cap(B)
    full_bytes = B * C * HW * x_itemsize
    if full_bytes <= cap:
        T_HW = HW                                     # single fully-contiguous DMA
    else:
        t = cap // max(1, B * C * x_itemsize)
        T_HW = max(t_floor, (t // 128) * 128)
        T_HW = min(T_HW, HW)
    return B, T_HW


def channel_attention(x_nchw, w1, w2, *, max_block_bytes=None):
    """
    x_nchw: (N, C, H, W) floating-point input.
    w1: (C//r, C)   -- first 1x1 conv weight (squeezed from (C//r, C, 1, 1))
    w2: (C, C//r)   -- second 1x1 conv weight (squeezed from (C, C//r, 1, 1))
    returns: (N, C, 1, 1) sigmoid attention map, matching the PyTorch forward.
    """
    assert jnp.issubdtype(x_nchw.dtype, jnp.floating), (
        "channel_attention: floating-point input required (-inf max init).")

    N, C, H, W = x_nchw.shape
    Cr = w1.shape[0]
    HW = H * W

    x_flat = x_nchw.reshape(N, C, HW)
    w1t = jnp.transpose(w1)                       # (C, Cr)
    w2t = jnp.transpose(w2)                       # (Cr, C)

    itemsize = x_flat.dtype.itemsize
    weight_bytes = (C * Cr + Cr * C) * w1.dtype.itemsize

    cfg = _tpu_config()
    if max_block_bytes is not None:
        cfg = dict(cfg, max_block_bytes=int(max_block_bytes))

    B, T_HW = _choose_tiling(N, C, HW, itemsize, weight_bytes, cfg)

    grid_n = pl.cdiv(N, B)
    grid_hw = pl.cdiv(HW, T_HW)
    needs_mask = (HW % T_HW) != 0

    kernel = functools.partial(_channel_attention_kernel,
                               hw_total=HW, needs_mask=needs_mask)

    cost = pl.CostEstimate(
        flops=int(2 * N * C * HW + 8 * N * C * Cr),
        transcendentals=int(N * C),
        bytes_accessed=int(N * C * HW * itemsize + weight_bytes
                           + N * C * itemsize),
    )

    # TODO(synk): if a trace shows a DMA bubble at the batch-block boundary
    # (finalize MLP), add pipeline_mode=pl.Buffered(3) to the x BlockSpec and
    # re-budget VMEM accordingly.
    out = pl.pallas_call(
        kernel,
        out_shape=jax.ShapeDtypeStruct((N, C), x_nchw.dtype),
        grid_spec=pltpu.PrefetchScalarGridSpec(
            num_scalar_prefetch=0,
            grid=(grid_n, grid_hw),
            in_specs=[
                pl.BlockSpec((B, C, T_HW), lambda n, h: (n, 0, h)),
                pl.BlockSpec((C, Cr), lambda n, h: (0, 0)),   # resident weights
                pl.BlockSpec((Cr, C), lambda n, h: (0, 0)),
            ],
            out_specs=pl.BlockSpec((B, C), lambda n, h: (n, 0)),
            scratch_shapes=[
                pltpu.VMEM((B, C), jnp.float32),   # running sum
                pltpu.VMEM((B, C), jnp.float32),   # running max
            ],
        ),
        compiler_params=pltpu.CompilerParams(
            dimension_semantics=("parallel", "arbitrary"),
            vmem_limit_bytes=cfg["vmem_limit_bytes"],
        ),
        cost_estimate=cost,
    )(x_flat, w1t, w2t)

    return out.reshape(N, C, 1, 1)


def channel_attention_ref(x_nchw, w1, w2):
    """Pure-JAX reference mirroring the PyTorch forward."""
    avg = jnp.mean(x_nchw, axis=(2, 3))          # (N, C)
    mx = jnp.max(x_nchw, axis=(2, 3))            # (N, C)

    def fc(p):
        h = jnp.maximum(p @ w1.T, 0.0)           # (N, Cr)
        return h @ w2.T                          # (N, C)

    out = jax.nn.sigmoid(fc(avg) + fc(mx))
    return out.reshape(*out.shape, 1, 1)


if __name__ == "__main__":
    key = jax.random.PRNGKey(0)
    k_x, k_w1, k_w2, k_x2 = jax.random.split(key, 4)

    # ---- test 1: small shapes, full-HW (single-tile) path --------------------
    N, C, H, W = 2, 32, 16, 16
    reduction = 16
    Cr = C // reduction

    x = jax.random.normal(k_x, (N, C, H, W), dtype=jnp.float32)
    w1 = jax.random.normal(k_w1, (Cr, C), dtype=jnp.float32) * (1.0 / C) ** 0.5
    w2 = jax.random.normal(k_w2, (C, Cr), dtype=jnp.float32) * (1.0 / Cr) ** 0.5

    out = jax.block_until_ready(channel_attention(x, w1, w2))
    ref = channel_attention_ref(x, w1, w2)
    assert out.shape == (N, C, 1, 1)
    assert jnp.allclose(out, ref, atol=1e-5, rtol=1e-5)

    # ---- test 2: force HW tiling + tail masking path (tiny block budget) -----
    N2, H2, W2 = 3, 24, 24                       # HW = 576 -> tiles of 512 + tail
    x2 = jax.random.normal(k_x2, (N2, C, H2, W2), dtype=jnp.float32)
    out2 = jax.block_until_ready(
        channel_attention(x2, w1, w2, max_block_bytes=64 * 1024))
    ref2 = channel_attention_ref(x2, w1, w2)
    assert out2.shape == (N2, C, 1, 1)
    assert jnp.allclose(out2, ref2, atol=1e-5, rtol=1e-5)

    print("KERNEL_OK")
</pallas_src>

<mosaic_0001>
module attributes {stable_mosaic.version = 11 : i64} {
  func.func @_channel_attention_kernel(%arg0: i32, %arg1: i32, %arg2: memref<2x32x256xf32, #tpu.memory_space<vmem>>, %arg3: memref<32x2xf32, #tpu.memory_space<vmem>>, %arg4: memref<2x32xf32, #tpu.memory_space<vmem>>, %arg5: memref<2x32xf32, #tpu.memory_space<vmem>>, %arg6: memref<2x32xf32, #tpu.memory_space<vmem>>, %arg7: memref<2x32xf32, #tpu.memory_space<vmem>>) attributes {dimension_semantics = [#tpu.dimension_semantics<parallel>, #tpu.dimension_semantics<arbitrary>], iteration_bounds = array<i64: 1, 1>, scalar_prefetch = 0 : i64, scratch_operands = 2 : i64, tpu.core_type = #tpu.core_type<tc>, window_params = [{transform_indices = @transform_0, window_bounds = array<i64: 2, 32, 256>}, {pipeline_mode = #tpu.pipeline_mode<synchronous>, transform_indices = @transform_1, window_bounds = array<i64: 32, 2>}, {pipeline_mode = #tpu.pipeline_mode<synchronous>, transform_indices = @transform_2, window_bounds = array<i64: 2, 32>}, {transform_indices = @transform_3, window_bounds = array<i64: 2, 32>}]} {
    %c0_i32 = arith.constant 0 : i32
    %0 = arith.cmpi eq, %arg1, %c0_i32 : i32
    %c0_i32_0 = arith.constant 0 : i32
    %1 = arith.cmpi eq, %arg1, %c0_i32_0 : i32
    %2 = arith.extui %1 : i1 to i32
    %c0_i32_1 = arith.constant 0 : i32
    %3 = arith.cmpi ne, %2, %c0_i32_1 : i32
    scf.if %3 {
      %cst_14 = arith.constant 0.000000e+00 : f32
      %15 = vector.broadcast %cst_14 : f32 to vector<2x32xf32>
      %c0_15 = arith.constant 0 : index
      %c0_16 = arith.constant 0 : index
      %16 = vector.load %arg6[%c0_15, %c0_16] : memref<2x32xf32, #tpu.memory_space<vmem>>, vector<2x32xf32>
      tpu.vector_store %arg6[%c0_15, %c0_16], %15 {strides = array<i32>} : memref<2x32xf32, #tpu.memory_space<vmem>>, vector<2x32xf32>,
      %cst_17 = arith.constant 0xFF800000 : f32
      %17 = vector.broadcast %cst_17 : f32 to vector<2x32xf32>
      %c0_18 = arith.constant 0 : index
      %c0_19 = arith.constant 0 : index
      %18 = vector.load %arg7[%c0_18, %c0_19] : memref<2x32xf32, #tpu.memory_space<vmem>>, vector<2x32xf32>
      tpu.vector_store %arg7[%c0_18, %c0_19], %17 {strides = array<i32>} : memref<2x32xf32, #tpu.memory_space<vmem>>, vector<2x32xf32>,
    } else {
    }
    %c0 = arith.constant 0 : index
    %c0_2 = arith.constant 0 : index
    %c0_3 = arith.constant 0 : index
    %4 = vector.load %arg2[%c0, %c0_2, %c0_3] : memref<2x32x256xf32, #tpu.memory_space<vmem>>, vector<2x32x256xf32>
    %c0_4 = arith.constant 0 : index
    %c0_5 = arith.constant 0 : index
    %5 = vector.load %arg6[%c0_4, %c0_5] : memref<2x32xf32, #tpu.memory_space<vmem>>, vector<2x32xf32>
    %cst = arith.constant dense<0.000000e+00> : vector<2x32xf32>
    %6 = vector.multi_reduction <add>, %4, %cst [2] : vector<2x32x256xf32> to vector<2x32xf32>
    %7 = arith.addf %5, %6 : vector<2x32xf32>
    %c0_6 = arith.constant 0 : index
    %c0_7 = arith.constant 0 : index
    %8 = vector.load %arg6[%c0_6, %c0_7] : memref<2x32xf32, #tpu.memory_space<vmem>>, vector<2x32xf32>
    tpu.vector_store %arg6[%c0_6, %c0_7], %7 {strides = array<i32>} : memref<2x32xf32, #tpu.memory_space<vmem>>, vector<2x32xf32>,
    %c0_8 = arith.constant 0 : index
    %c0_9 = arith.constant 0 : index
    %9 = vector.load %arg7[%c0_8, %c0_9] : memref<2x32xf32, #tpu.memory_space<vmem>>, vector<2x32xf32>
    %cst_10 = arith.constant dense<0xFF800000> : vector<2x32xf32>
    %10 = vector.multi_reduction <maximumf>, %4, %cst_10 [2] : vector<2x32x256xf32> to vector<2x32xf32>
    %11 = arith.maximumf %9, %10 : vector<2x32xf32>
    %c0_11 = arith.constant 0 : index
    %c0_12 = arith.constant 0 : index
    %12 = vector.load %arg7[%c0_11, %c0_12] : memref<2x32xf32, #tpu.memory_space<vmem>>, vector<2x32xf32>
    tpu.vector_store %arg7[%c0_11, %c0_12], %11 {strides = array<i32>} : memref<2x32xf32, #tpu.memory_space<vmem>>, vector<2x32xf32>,
    %13 = arith.extui %0 : i1 to i32
    %c0_i32_13 = arith.constant 0 : i32
    %14 = arith.cmpi ne, %13, %c0_i32_13 : i32
    scf.if %14 {
      %c0_14 = arith.constant 0 : index
      %c0_15 = arith.constant 0 : index
      %15 = vector.load %arg6[%c0_14, %c0_15] : memref<2x32xf32, #tpu.memory_space<vmem>>, vector<2x32xf32>
      %cst_16 = arith.constant 3.906250e-03 : f32
      %16 = vector.broadcast %cst_16 : f32 to vector<2x32xf32>
      %17 = arith.mulf %15, %16 : vector<2x32xf32>
      %c0_17 = arith.constant 0 : index
      %c0_18 = arith.constant 0 : index
      %18 = vector.load %arg7[%c0_17, %c0_18] : memref<2x32xf32, #tpu.memory_space<vmem>>, vector<2x32xf32>
      %19 = tpu.concatenate %17, %18 in 0 : vector<2x32xf32>, vector<2x32xf32> -> vector<4x32xf32>
      %c0_19 = arith.constant 0 : index
      %c0_20 = arith.constant 0 : index
      %20 = vector.load %arg3[%c0_19, %c0_20] : memref<32x2xf32, #tpu.memory_space<vmem>>, vector<32x2xf32>
      %c0_21 = arith.constant 0 : index
      %c0_22 = arith.constant 0 : index
      %21 = vector.load %arg4[%c0_21, %c0_22] : memref<2x32xf32, #tpu.memory_space<vmem>>, vector<2x32xf32>
      %cst_23 = arith.constant dense<0.000000e+00> : vector<4x2xf32>
      %22 = tpu.matmul %19, %20, %cst_23 {dimension_numbers = #tpu.dot_dimension_numbers<[1], [0], [0], [1], [0, 0, 1, 1], [], []>} : vector<4x32xf32>, vector<32x2xf32>, vector<4x2xf32> -> vector<4x2xf32>
      %cst_24 = arith.constant 0.000000e+00 : f32
      %23 = vector.broadcast %cst_24 : f32 to vector<4x2xf32>
      %24 = arith.maximumf %22, %23 : vector<4x2xf32>
      %cst_25 = arith.constant dense<0.000000e+00> : vector<4x32xf32>
      %25 = tpu.matmul %24, %21, %cst_25 {dimension_numbers = #tpu.dot_dimension_numbers<[1], [0], [0], [1], [0, 0, 1, 1], [], []>} : vector<4x2xf32>, vector<2x32xf32>, vector<4x32xf32> -> vector<4x32xf32>
      %26 = vector.extract_strided_slice %25 {offsets = [0, 0], sizes = [2, 32], strides = [1, 1]} : vector<4x32xf32> to vector<2x32xf32>
      %27 = vector.extract_strided_slice %25 {offsets = [2, 0], sizes = [2, 32], strides = [1, 1]} : vector<4x32xf32> to vector<2x32xf32>
      %28 = arith.addf %26, %27 : vector<2x32xf32>
      %29 = arith.negf %28 : vector<2x32xf32>
      %30 = math.exp %29 : vector<2x32xf32>
      %cst_26 = arith.constant 1.000000e+00 : f32
      %31 = vector.broadcast %cst_26 : f32 to vector<2x32xf32>
      %32 = arith.addf %31, %30 : vector<2x32xf32>
      %33 = arith.divf %31, %32 : vector<2x32xf32>
      %c0_27 = arith.constant 0 : index
      %c0_28 = arith.constant 0 : index
      %34 = vector.load %arg5[%c0_27, %c0_28] : memref<2x32xf32, #tpu.memory_space<vmem>>, vector<2x32xf32>
      tpu.vector_store %arg5[%c0_27, %c0_28], %33 {strides = array<i32>} : memref<2x32xf32, #tpu.memory_space<vmem>>, vector<2x32xf32>,
    } else {
    }
    return
  }
  func.func @transform_0(%arg0: i32, %arg1: i32) -> (i32, i32, i32) {
    %c0_i32 = arith.constant 0 : i32
    %c0_i32_0 = arith.constant 0 : i32
    return %arg0, %c0_i32, %arg1 : i32, i32, i32
  }
  func.func @transform_1(%arg0: i32, %arg1: i32) -> (i32, i32) {
    %c0_i32 = arith.constant 0 : i32
    %c0_i32_0 = arith.constant 0 : i32
    %c0_i32_1 = arith.constant 0 : i32
    return %c0_i32, %c0_i32_0 : i32, i32
  }
  func.func @transform_2(%arg0: i32, %arg1: i32) -> (i32, i32) {
    %c0_i32 = arith.constant 0 : i32
    %c0_i32_0 = arith.constant 0 : i32
    %c0_i32_1 = arith.constant 0 : i32
    return %c0_i32, %c0_i32_0 : i32, i32
  }
  func.func @transform_3(%arg0: i32, %arg1: i32) -> (i32, i32) {
    %c0_i32 = arith.constant 0 : i32
    %c0_i32_0 = arith.constant 0 : i32
    return %arg0, %c0_i32 : i32, i32
  }
}

</mosaic_0001>

<bundles_post_ra>
// kernel: tpu_custom_call.1
= control target key start
LH: loop header
LB: loop body
LE: loop exit
PB: predicated region body
PF: predicated region fallthrough
CT: control target
= control target key end

     0   :  { %8 = vsyncpa [#allocation5], 0  ;;  %s674_s0 = inlined_call_operand.hbm [shape: f32[2,32,256], index: 0, kind: input, shape index: {}]   ;;  %s675_s1 = inlined_call_operand.hbm [shape: f32[32,2], index: 1, kind: input, shape index: {}]   ;;  %s676_s2 = inlined_call_operand.hbm [shape: f32[2,32], index: 2, kind: input, shape index: {}]   ;;  %s677_s3 = inlined_call_operand.hbm [shape: f32[2,32], index: 3, kind: output, shape index: {}]  }
   0x1   :  { %9 = vsyncpa [#allocation8], 0 }
   0x2   :  { %10 = vsyncpa [#allocation6], 0  ;;  %s575_s12 = smov [#allocation7]   ;;  %s481_s16 = scalar_lea.hbm %s675_s1, 512 }
   0x3   :  { %s28_s13 = sshll.u32 %s575_s12, 4  ;;  %p482_p0 = scmp.ne.s32.totalorder %s675_s1, %s481_s16  ;;  %s29_s13 = int_to_ptr.vmem [resolvable:$true] %s28_s13 }
   0x4   :  { %p485_p1 = scmp.lt.u32.totalorder %s481_s16, %s675_s1 }
   0x6   :  { %p487_p2 = pnand %p485_p1, %p482_p0 }
   0x8   :  { %490 = shalt.err (!%p487_p2)
}
   0x9   :  { %s491_s21 = scalar_lea.vmem %s29_s13, 512  ;;  %p496_p4 = scmp.lt.s32.totalorder %s29_s13, %s29_s13 }
   0xa   :  { %p492_p3 = scmp.ne.s32.totalorder %s29_s13, %s491_s21  ;;  %p497_p5 = scmp.lt.s32.totalorder %s491_s21, %s491_s21 }
   0xc   :  { %p498_p6 = por %p497_p5, %p496_p4 }
   0xe   :  { %p499_p7 = pnand %p498_p6, %p492_p3 }
  0x10   :  { %502 = shalt.err (!%p499_p7)
}
  0x11   :  { %s576_s22 = smov 128   ;;  %s577_s23 = smov 8  }
  0x12   :  { %34 = dma.hbm_to_vmem [thread:$0]  %s675_s1, 512, %s29_s13, [#allocation8], %s576_s22, %s576_s22, %s577_s23  }
  0x13   :  { %s578_s26 = smov [#allocation4]   ;;  %s503_s30 = scalar_lea.hbm %s674_s0, 2048 }
  0x14   :  { %s16_s27 = sshll.u32 %s578_s26, 4  ;;  %p504_p8 = scmp.ne.s32.totalorder %s674_s0, %s503_s30  ;;  %s17_s27 = int_to_ptr.vmem [resolvable:$true] %s16_s27 }
  0x15   :  { %p507_p9 = scmp.lt.u32.totalorder %s503_s30, %s674_s0 }
  0x17   :  { %p509_p10 = pnand %p507_p9, %p504_p8 }
  0x19   :  { %512 = shalt.err (!%p509_p10)
}
  0x1a   :  { %s513_s8 = scalar_lea.vmem %s17_s27, 2048  ;;  %p518_p12 = scmp.lt.s32.totalorder %s17_s27, %s17_s27 }
  0x1b   :  { %p514_p11 = scmp.ne.s32.totalorder %s17_s27, %s513_s8  ;;  %p519_p13 = scmp.lt.s32.totalorder %s513_s8, %s513_s8 }
  0x1d   :  { %p520_p0 = por %p519_p13, %p518_p12 }
  0x1f   :  { %p521_p1 = pnand %p520_p0, %p514_p11 }
  0x21   :  { %524 = shalt.err (!%p521_p1)
}
  0x22   :  { %s579_s1 = smov 256   ;;  %s580_s9 = smov 16  }
  0x23   :  { %22 = dma.hbm_to_vmem [thread:$0]  %s674_s0, 2048, %s17_s27, [#allocation5], %s579_s1, %s579_s1, %s580_s9  }
  0x24   :  { %s581_s12 = smov [#allocation9]   ;;  %s525_s16 = scalar_lea.hbm %s676_s2, 32 }
  0x25   :  { %s41_s13 = sshll.u32 %s581_s12, 4  ;;  %p526_p2 = scmp.ne.s32.totalorder %s676_s2, %s525_s16  ;;  %s42_s13 = int_to_ptr.vmem [resolvable:$true] %s41_s13 }
  0x26   :  { %p529_p3 = scmp.lt.u32.totalorder %s525_s16, %s676_s2 }
  0x28   :  { %p531_p4 = pnand %p529_p3, %p526_p2 }
  0x2a   :  { %534 = shalt.err (!%p531_p4)
}
  0x2b   :  { %s535_s21 = scalar_lea.vmem %s42_s13, 32  ;;  %p540_p6 = scmp.lt.s32.totalorder %s42_s13, %s42_s13 }
  0x2c   :  { %p536_p5 = scmp.ne.s32.totalorder %s42_s13, %s535_s21  ;;  %p541_p7 = scmp.lt.s32.totalorder %s535_s21, %s535_s21 }
  0x2e   :  { %p542_p8 = por %p541_p7, %p540_p6 }
  0x30   :  { %p543_p9 = pnand %p542_p8, %p536_p5 }
  0x32   :  { %546 = shalt.err (!%p543_p9)
}
  0x33   :  { %44 = dma.hbm_to_vmem [thread:$0]  %s676_s2, 32, %s42_s13, [#allocation8]  }
  0x34   :  { %569 = dma.done.wait [#allocation5], 2048  }
  0x35   :  { %570 = vsyncadd [#allocation5], 4294965248 }
  0x36   :  { %571 = dma.done.wait [#allocation8], 544  }
  0x37   :  { %572 = vsyncadd [#allocation8], 4294966752  ;;  %v69_v0 = vld [vmem:[#allocation4 + $0x40] sm:$0xff]  ;;  %v70_v1 = vld [vmem:[#allocation4 + $0x48] sm:$0xff]  ;;  %vm58_vm0 = vcmask 254976   ;;  %v582_v32 = vmov 0.0   ;;  %v110_v45 = vlaneseq }
  0x38   :  { %v61_v2 = vld [vmem:[#allocation4] sm:$0xff]  ;;  %v90_v3 = vadd.f32 %v70_v1, %v69_v0  ;;  %v62_v4 = vld [vmem:[#allocation4 + $0x8] sm:$0xff]  ;;  %v71_v5 = vld [vmem:[#allocation4 + $0x50] sm:$0xff]  ;;  %v175_v15 = vmax.f32 %v69_v0, %v70_v1  ;;  %59 = vst.msk [vmem:[#allocation2] sm:$0x3] %vm58_vm0, %v582_v32  ;;  %454 = vmatprep.subr.mxu1 %v582_v32  ;;  %v583_v33 = vmov -inf  }
  0x39   :  { %v72_v6 = vld [vmem:[#allocation4 + $0x58] sm:$0xff]  ;;  %v78_v7 = vadd.f32 %v62_v4, %v61_v2  ;;  %v63_v8 = vld [vmem:[#allocation4 + $0x10] sm:$0xff]  ;;  %v163_v13 = vmax.f32 %v61_v2, %v62_v4  ;;  %v73_v16 = vld [vmem:[#allocation4 + $0x60] sm:$0xff]  ;;  %60 = vst.msk [vmem:[#allocation3] sm:$0x3] %vm58_vm0, %v583_v33  ;;  %v584_v37 = vmov 0.0|0.0  }
  0x3a   :  { %v64_v9 = vld [vmem:[#allocation4 + $0x18] sm:$0xff]  ;;  %91 = vadd.xlane.f32.xlu1 %v90_v3  ;;  %v93_v10 = vadd.f32 %v72_v6, %v71_v5  ;;  %v178_v14 = vmax.f32 %v71_v5, %v72_v6  ;;  %v74_v17 = vld [vmem:[#allocation4 + $0x68] sm:$0xff]  ;;  %v65_v18 = vld [vmem:[#allocation4 + $0x20] sm:$0xff]  ;;  %459 = vmatprep.subr.bf16.mxu0 %v584_v37  ;;  %vm585_vm1 = vmmov 0   ;;  %v111_v48 = vand.u32 127, %v110_v45  ;;  %s586_s2 = smov [#allocation10]  }
  0x3b   :  { %79 = vadd.xlane.f32.xlu0 %v78_v7  ;;  %v81_v11 = vadd.f32 %v64_v9, %v63_v8  ;;  %v166_v12 = vmax.f32 %v63_v8, %v64_v9  ;;  %v66_v19 = vld [vmem:[#allocation4 + $0x28] sm:$0xff]  ;;  %v96_v20 = vadd.f32 %v74_v17, %v73_v16  ;;  %v181_v22 = vmax.f32 %v73_v16, %v74_v17  ;;  %v75_v24 = vld [vmem:[#allocation4 + $0x70] sm:$0xff]  ;;  %v76_v25 = vld [vmem:[#allocation4 + $0x78] sm:$0xff]  ;;  %s422_s23 = sshll.u32 %s586_s2, 4  ;;  %s423_s23 = int_to_ptr.vmem [resolvable:$true] %s422_s23 }
  0x3c   :  { %v84_v21 = vadd.f32 %v66_v19, %v65_v18  ;;  %v169_v23 = vmax.f32 %v65_v18, %v66_v19  ;;  %v67_v26 = vld [vmem:[#allocation4 + $0x30] sm:$0xff]  ;;  %v68_v27 = vld [vmem:[#allocation4 + $0x38] sm:$0xff]  ;;  %v99_v28 = vadd.f32 %v76_v25, %v75_v24  ;;  %v184_v30 = vmax.f32 %v75_v24, %v76_v25  ;;  %v248_v34 = vld [vmem:[#allocation7] sm:$0xff]  ;;  %451 = vmatprep.mubr.msk.f32.mxu0 %vm585_vm1, %v582_v32  ;;  %s547_s24 = scalar_lea.vmem %s423_s23, 32  ;;  %p552_p11 = scmp.lt.s32.totalorder %s423_s23, %s423_s23 }
  0x3d   :  { %v87_v29 = vadd.f32 %v68_v27, %v67_v26  ;;  %v172_v31 = vmax.f32 %v67_v26, %v68_v27  ;;  %v249_v35 = vld [vmem:[#allocation7 + $0x8] sm:$0xff]  ;;  %v250_v36 = vld [vmem:[#allocation7 + $0x10] sm:$0xff]  ;;  %v251_v39 = vld [vmem:[#allocation7 + $0x18] sm:$0xff]  ;;  %456 = vmatprep.mubr.msk.f32.mxu1 %vm585_vm1, %v582_v32  ;;  %v116_v49 = vadd.s32 4294967288, %v111_v48  ;;  %v113_v52 = vshrl.u32 %v110_v45, 7  ;;  %p548_p10 = scmp.ne.s32.totalorder %s423_s23, %s547_s24  ;;  %p553_p12 = scmp.lt.s32.totalorder %s547_s24, %s547_s24 }
  0x3e   :  { %94 = vadd.xlane.f32.xlu1 %v93_v10  ;;  %v460_v38 = vpack.c.bf16 %v249_v35, %v248_v34  ;;  %v463_v40 = vpack.c.bf16 %v251_v39, %v250_v36  ;;  %v123_v53 = vadd.s32 4294967280, %v111_v48  ;;  %v130_v57 = vadd.s32 4294967272, %v111_v48 }
  0x3f   :  { %82 = vadd.xlane.f32.xlu0 %v81_v11  ;;  %v119_v54 = vsub.s32 %v116_v49, %v113_v52  ;;  %v114_v58 = vsub.s32 %v111_v48, %v113_v52  ;;  %vm121_vm2 = vcmask 130112   ;;  %vm128_vm3 = vcmask 195712   ;;  %p554_p13 = por %p553_p12, %p552_p11 }
  0x40   :  { %461 = vmatpush3.bf16.msra.mxu0 %v460_v38  ;;  %v126_v59 = vsub.s32 %v123_v53, %v113_v52  ;;  %v133_v0 = vsub.s32 %v130_v57, %v113_v52  ;;  %vm135_vm4 = vcmask 261312   ;;  %vm156_vm5 = vcmask 1041409   ;;  %v162_v33 = vld [vmem:[#allocation3] sm:$0x3] }
  0x41   :  { %462 = vmatprep.subr.bf16.mxu0 %v584_v37  ;;  %vm246_vm6 = vcmask 1041408   ;;  %vm253_vm7 = vcmask 261120   ;;  %vm328_vm8 = vcmask 15360   ;;  %p555_p0 = pnand %p554_p13, %p548_p10 }
  0x42   :  { %167 = vmax.xlane.f32.xlu1 %v166_v12 }
  0x43   :  { %164 = vmax.xlane.f32.xlu0 %v163_v13 }
  0x44   :  { %464 = vmatpush3.bf16.msra.mxu0 %v463_v40 }
  0x46   :  { %179 = vmax.xlane.f32.xlu1 %v178_v14 }
  0x47   :  { %176 = vmax.xlane.f32.xlu0 %v175_v15 }
  0x4a   :  { %97 = vadd.xlane.f32.xlu1 %v96_v20  ;;  %v77_v20 = vld [vmem:[#allocation2] sm:$0x3] }
  0x4b   :  { %85 = vadd.xlane.f32.xlu0 %v84_v21 }
  0x4e   :  { %182 = vmax.xlane.f32.xlu1 %v181_v22 }
  0x4f   :  { %170 = vmax.xlane.f32.xlu0 %v169_v23 }
  0x52   :  { %100 = vadd.xlane.f32.xlu1 %v99_v28 }
  0x53   :  { %88 = vadd.xlane.f32.xlu0 %v87_v29 }
  0x56   :  { %185 = vmax.xlane.f32.xlu1 %v184_v30 }
  0x57   :  { %173 = vmax.xlane.f32.xlu0 %v172_v31 }
  0xc7   :  { %v92_v41 = vpop.xlane.xlu1 %91 }
  0xc8   :  { %v80_v42 = vpop.xlane.xlu0 %79  ;;  %v140_v1 = vrot.slane %v92_v41, %v114_v58 }
  0xc9   :  { %v115_v2 = vrot.slane %v80_v42, %v114_v58  ;;  %v252_v42 = vld [vmem:[#allocation9] sm:$0x3] }
  0xca   :  { %455 = vmatpush3.msk.msra.mxu1 %vm246_vm6, %v252_v42 }
  0xcb   :  { %v95_v43 = vpop.xlane.xlu1 %94 }
  0xcc   :  { %v83_v44 = vpop.xlane.xlu0 %82  ;;  %v144_v60 = vrot.slane %v95_v43, %v119_v54 }
  0xcd   :  { %v120_v61 = vrot.slane %v83_v44, %v119_v54 }
  0xce   :  { %v145_v5 = vsel %vm121_vm2, %v144_v60, %v140_v1 }
  0xcf   :  { %v168_v46 = vpop.xlane.xlu1 %167  ;;  %v122_v6 = vsel %vm121_vm2, %v120_v61, %v115_v2 }
  0xd0   :  { %v165_v47 = vpop.xlane.xlu0 %164  ;;  %v202_v8 = vrot.slane %v168_v46, %v119_v54 }
  0xd1   :  { %v198_v13 = vrot.slane %v165_v47, %v114_v58 }
  0xd3   :  { %v180_v50 = vpop.xlane.xlu1 %179  ;;  %v203_v27 = vsel %vm121_vm2, %v202_v8, %v198_v13 }
  0xd4   :  { %v177_v51 = vpop.xlane.xlu0 %176  ;;  %v221_v9 = vrot.slane %v180_v50, %v119_v54 }
  0xd5   :  { %v217_v10 = vrot.slane %v177_v51, %v114_v58 }
  0xd7   :  { %v98_v55 = vpop.xlane.xlu1 %97  ;;  %v222_v23 = vsel %vm121_vm2, %v221_v9, %v217_v10 }
  0xd8   :  { %v86_v56 = vpop.xlane.xlu0 %85  ;;  %v149_v3 = vrot.slane %v98_v55, %v126_v59 }
  0xd9   :  { %v127_v4 = vrot.slane %v86_v56, %v126_v59 }
  0xda   :  { %v150_v14 = vsel %vm128_vm3, %v149_v3, %v145_v5 }
  0xdb   :  { %v183_v62 = vpop.xlane.xlu1 %182  ;;  %v129_v17 = vsel %vm128_vm3, %v127_v4, %v122_v6 }
  0xdc   :  { %v171_v63 = vpop.xlane.xlu0 %170  ;;  %v226_v15 = vrot.slane %v183_v62, %v126_v59 }
  0xdd   :  { %v207_v18 = vrot.slane %v171_v63, %v126_v59 }
  0xde   :  { %v227_v28 = vsel %vm128_vm3, %v226_v15, %v222_v23 }
  0xdf   :  { %v101_v7 = vpop.xlane.xlu1 %100  ;;  %v208_v31 = vsel %vm128_vm3, %v207_v18, %v203_v27 }
  0xe0   :  { %v154_v11 = vrot.slane %v101_v7, %v133_v0  ;;  %v89_v12 = vpop.xlane.xlu0 %88 }
  0xe1   :  { %v134_v16 = vrot.slane %v89_v12, %v133_v0 }
  0xe2   :  { %v155_v19 = vsel %vm135_vm4, %v154_v11, %v150_v14 }
  0xe3   :  { %v136_v21 = vsel %vm135_vm4, %v134_v16, %v129_v17  ;;  %v186_v22 = vpop.xlane.xlu1 %185 }
  0xe4   :  { %v157_v24 = vsel %vm156_vm5, %v155_v19, %v136_v21  ;;  %v231_v25 = vrot.slane %v186_v22, %v133_v0  ;;  %v174_v26 = vpop.xlane.xlu0 %173 }
  0xe5   :  { %v212_v29 = vrot.slane %v174_v26, %v133_v0  ;;  %v159_v30 = vadd.f32 %v157_v24, %v77_v20 }
  0xe6   :  { %v232_v32 = vsel %vm135_vm4, %v231_v25, %v227_v28 }
  0xe7   :  { %v213_v34 = vsel %vm135_vm4, %v212_v29, %v208_v31  ;;  %161 = vst.msk [vmem:[#allocation2] sm:$0x3] %vm58_vm0, %v159_v30 }
  0xe8   :  { %v233_v35 = vsel %vm156_vm5, %v232_v32, %v213_v34 }
  0xe9   :  { %v235_v36 = vmax.f32 %v162_v33, %v233_v35 }
  0xeb   :  { %236 = vst.msk [vmem:[#allocation3] sm:$0x3] %vm58_vm0, %v235_v36 }
  0xee   :  { %v240_v37 = vld [vmem:[#allocation2] sm:$0x3] }
  0xef   :  { %v241_v39 = vmul.f32 0.00390625, %v240_v37 }
  0xf2   :  { %v242_v38 = vld [vmem:[#allocation3] sm:$0x3] }
  0xf3   :  { %v244_v40 = vrot.slane %v242_v38, 6 }
  0xf5   :  { %v247_v41 = vsel %vm246_vm6, %v241_v39, %v244_v40 }
  0xf6   :  { %452 = vmatmul.mubr.msk.f32.vlgmr.msra.gmra.mrb[0].mxu0 %vm253_vm7, %v247_v41 }
 0x1c9   :  { %v323_v43 = vpop.f32.mrb[0].mxu0 }
 0x1ca   :  { %v327_v44 = vmax.f32 %v323_v43, 0.0  ;;  %v453_v45 = vpop.f32.mrb[1].mxu0 }
 0x1cc   :  { %457 = vmatmul.mubr.msk.f32.vlgmr.msra.gmra.mrb[0].mxu1 %vm328_vm8, %v327_v44 }
 0x29f   :  { %v401_v46 = vpop.f32.mrb[0].mxu1 }
 0x2a0   :  { %v406_v47 = vrot.slane %v401_v46, 2  ;;  %v458_v48 = vpop.f32.mrb[1].mxu1 }
 0x2a2   :  { %v408_v49 = vadd.f32 %v406_v47, %v401_v46 }
 0x2a4   :  { %v435_v50 = vmul.f32 -1.442695, %v408_v49 }
 0x2a6   :  { %477 = vpow2.f32 %v435_v50 }
 0x2b0   :  { %v478_v51 = vpop.eup %477 }
 0x2b1   :  { %v412_v52 = vadd.f32 1.0, %v478_v51 }
 0x2b3   :  { %479 = vrcp.f32 %v412_v52 }
 0x2bd   :  { %v480_v53 = vpop.eup %479 }
 0x2be   :  { %415 = vst.msk [vmem:[#allocation10] sm:$0x3] %vm58_vm0, %v480_v53 }
 0x2bf   :  { %558 = shalt.err (!%p555_p0)
}
 0x2c0   :  { %s559_s27 = scalar_lea.hbm %s677_s3, 32 }
 0x2c1   :  { %p560_p1 = scmp.ne.s32.totalorder %s677_s3, %s559_s27  ;;  %p563_p2 = scmp.lt.u32.totalorder %s559_s27, %s677_s3 }
 0x2c3   :  { %p565_p3 = pnand %p563_p2, %p560_p1 }
 0x2c5   :  { %568 = shalt.err (!%p565_p3)
}
 0x2c6   :  { %425 = dma.vmem_to_hbm [thread:$0]  %s423_s23, 32, %s677_s3, [#allocation6]  }
 0x2c7   :  { %573 = dma.done.wait [#allocation6], 32  }
 0x2c8   :  { %574 = vsyncadd [#allocation6], 4294967264 }
 0x2c9   :  { %429 = vsyncpa [#allocation5], 1 }
 0x2ca   :  { %430 = vsyncpa [#allocation8], 1 }
 0x2cb   :  { %431 = vsyncpa [#allocation6], 1 }

</bundles_post_ra>
